<compile_context>
chip_gen: v6e
topology: v6e:2x2x1
jax: 0.10.0
libtpu: 0.0.40
codegen_flags: <defaults>
</compile_context>

<pallas_src>
import functools

import jax
import jax.numpy as jnp
from jax.experimental import pallas as pl
from jax.experimental.pallas import tpu as pltpu


def _endown_kernel(wo, s, xp_ref, w_ref, o_ref):
    """One block of NB images of y = conv3x3(stride=2, pad=1)(x) + bias.

    xp_ref: (1, 4*Cin, NB*S)  parity planes, batch folded into lanes:
            xp[0, (ry*2+rx)*Cin + ci, b*S + i*wo + j] = x[b, ci, 2i+ry, 2j+rx]
    w_ref : (Cout, Cin*9 + 1) w[co, ci*9 + dy*3 + dx] = W[co,ci,dy,dx];
            last column is the bias.
    o_ref : (1, Cout, NB*S)
    """
    cin = xp_ref.shape[1] // 4
    lanes = xp_ref.shape[2]          # NB * S
    cout = o_ref.shape[1]

    # One full-width load each for activations and weights+bias.
    xp = xp_ref[0].astype(jnp.float32)        # (4*Cin, NB*S)
    w_all = w_ref[...].astype(jnp.float32)    # (Cout, Cin*9 + 1)

    # Per-lane coordinates inside each folded image.
    lane = jax.lax.broadcasted_iota(jnp.int32, (1, lanes), 1)
    pos = lane % s        # i*wo + j within the image
    col = lane % wo       # output column j within the image

    # For kernel offset d (0..2) the input row/col index is 2*o + d - 1:
    #   d=0 -> odd-parity plane, one output-step back; d=1 -> even, no step;
    #   d=2 -> odd, no step.
    par = (1, 0, 1)
    back = (1, 0, 0)

    # Accumulate the 9 taps into 4 shift-class accumulators keyed by
    # (row-step-back, col-step-back).  Each tap is Cin VPU broadcast FMAs.
    acc = {(dr, dc): jnp.zeros((cout, lanes), jnp.float32)
           for dr in (0, 1) for dc in (0, 1)}
    for dy in range(3):
        ry, dr = par[dy], back[dy]
        for dx in range(3):
            rx, dc = par[dx], back[dx]
            t = dy * 3 + dx
            p = ry * 2 + rx
            a = acc[(dr, dc)]
            for ci in range(cin):
                k = ci * 9 + t
                wv = w_all[:, k:k + 1]                   # (Cout, 1)  static lane slice
                src = xp[p * cin + ci:p * cin + ci + 1]  # (1, NB*S)  static sublane slice
                a = a + wv * src                         # -> (Cout, NB*S)
            acc[(dr, dc)] = a

    def shift_back(v, dr, dc):
        # out[b, i, j] = v[b, i-dr, j-dc], zero-filled at the image border and
        # gated per-image so shifts never bleed between the folded images.
        k = dr * wo + dc
        v = pltpu.roll(v, shift=k, axis=1)       # XLU vrot: out[l] = v[l-k]
        ok = pos >= k                            # mask all k wrapped lanes / top rows
        if dc:
            ok = jnp.logical_and(ok, col != 0)   # left image border
        return jnp.where(ok, v, 0.0)

    y = (acc[(0, 0)]
         + shift_back(acc[(0, 1)], 0, 1)
         + shift_back(acc[(1, 0)], 1, 0)
         + shift_back(acc[(1, 1)], 1, 1))
    y = y + w_all[:, cin * 9:cin * 9 + 1]        # bias: one (Cout,1) broadcast add
    o_ref[0] = y.astype(o_ref.dtype)


def _pick_nb(n, s):
    """Smallest batch-fold NB dividing n with NB*S a multiple of 128 lanes."""
    for nb in range(1, n + 1):
        if n % nb == 0 and (nb * s) % 128 == 0 and nb * s <= 65536:
            return nb
    return n


def endown_forward(x, weight, bias):
    """EnDown.forward: nn.Conv2d(Cin, Cout, 3, stride=2, padding=1)(x).

    x: (N, Cin, H, W) NCHW (H, W even); weight: (Cout, Cin, 3, 3) OIHW;
    bias: (Cout,).  Returns (N, Cout, H//2, W//2) NCHW.
    """
    n, cin, h, w = x.shape
    cout = weight.shape[0]
    assert h % 2 == 0 and w % 2 == 0
    ho, wo = h // 2, w // 2
    s = ho * wo

    nb = _pick_nb(n, s)
    n_blocks = n // nb
    lanes = nb * s

    # Space-to-depth parity split + batch fold (pure layout plumbing):
    # xp[blk, (ry*2+rx)*cin + ci, b*s + i*wo + j] = x[blk*nb + b, ci, 2i+ry, 2j+rx]
    x6 = x.reshape(n_blocks, nb, cin, ho, 2, wo, 2)
    xp = x6.transpose(0, 4, 6, 2, 1, 3, 5).reshape(n_blocks, 4 * cin, lanes)

    # Weights laid out with taps on the lane axis, bias appended as one extra
    # column -> single (Cout, Cin*9 + 1) load in the kernel.
    wb = jnp.concatenate(
        [weight.reshape(cout, cin * 9), bias.reshape(cout, 1)],
        axis=1).astype(x.dtype)

    out = pl.pallas_call(
        functools.partial(_endown_kernel, wo, s),
        out_shape=jax.ShapeDtypeStruct((n_blocks, cout, lanes), x.dtype),
        grid=(n_blocks,),
        in_specs=[
            pl.BlockSpec((1, 4 * cin, lanes), lambda i: (i, 0, 0)),
            pl.BlockSpec((cout, cin * 9 + 1), lambda i: (0, 0)),
        ],
        out_specs=pl.BlockSpec((1, cout, lanes), lambda i: (i, 0, 0)),
        compiler_params=pltpu.CompilerParams(
            dimension_semantics=("parallel",)),
    )(xp, wb)

    out = out.reshape(n_blocks, cout, nb, ho, wo)
    out = out.transpose(0, 2, 1, 3, 4).reshape(n, cout, ho, wo)
    return out


# ------------------------------ pure-JAX reference ---------------------------

def endown_ref(x, weight, bias):
    y = jax.lax.conv_general_dilated(
        x, weight, window_strides=(2, 2), padding=((1, 1), (1, 1)),
        dimension_numbers=("NCHW", "OIHW", "NCHW"))
    return y + bias.reshape(1, -1, 1, 1)


# ------------------------------------ main -----------------------------------

if __name__ == "__main__":
    N, C_IN, H, W = 2, 4, 16, 16
    C_OUT = 8

    key = jax.random.PRNGKey(0)
    kx, kw, kb = jax.random.split(key, 3)
    x = jax.random.normal(kx, (N, C_IN, H, W), jnp.float32)
    weight = 0.2 * jax.random.normal(kw, (C_OUT, C_IN, 3, 3), jnp.float32)
    bias = 0.1 * jax.random.normal(kb, (C_OUT,), jnp.float32)

    y = jax.block_until_ready(endown_forward(x, weight, bias))
    y_ref = jax.block_until_ready(endown_ref(x, weight, bias))

    assert y.shape == (N, C_OUT, H // 2, W // 2)
    max_err = float(jnp.max(jnp.abs(y - y_ref)))
    assert jnp.allclose(y, y_ref, atol=1e-4, rtol=1e-4), (
        f"mismatch vs reference: max abs err = {max_err}")

    print("KERNEL_OK")
</pallas_src>

<mosaic_0001>
module attributes {stable_mosaic.version = 11 : i64} {
  func.func @_endown_kernel(%arg0: i32, %arg1: memref<1x16x128xf32, #tpu.memory_space<vmem>>, %arg2: memref<8x37xf32, #tpu.memory_space<vmem>>, %arg3: memref<1x8x128xf32, #tpu.memory_space<vmem>>) attributes {dimension_semantics = [#tpu.dimension_semantics<parallel>], iteration_bounds = array<i64: 1>, scalar_prefetch = 0 : i64, scratch_operands = 0 : i64, tpu.core_type = #tpu.core_type<tc>, window_params = [{transform_indices = @transform_0, window_bounds = array<i64: 1, 16, 128>}, {pipeline_mode = #tpu.pipeline_mode<synchronous>, transform_indices = @transform_1, window_bounds = array<i64: 8, 37>}, {transform_indices = @transform_2, window_bounds = array<i64: 1, 8, 128>}]} {
    %c0 = arith.constant 0 : index
    %c0_0 = arith.constant 0 : index
    %c0_1 = arith.constant 0 : index
    %0 = vector.load %arg1[%c0, %c0_0, %c0_1] : memref<1x16x128xf32, #tpu.memory_space<vmem>>, vector<1x16x128xf32>
    %1 = vector.shape_cast %0 : vector<1x16x128xf32> to vector<16x128xf32>
    %c0_2 = arith.constant 0 : index
    %c0_3 = arith.constant 0 : index
    %2 = vector.load %arg2[%c0_2, %c0_3] : memref<8x37xf32, #tpu.memory_space<vmem>>, vector<8x37xf32>
    %3 = tpu.iota {dimensions = array<i32: 1>} : vector<1x128xi32>
    %c64_i32 = arith.constant 64 : i32
    %c0_i32 = arith.constant 0 : i32
    %4 = arith.cmpi eq, %c64_i32, %c0_i32 : i32
    %c1_i32 = arith.constant 1 : i32
    %5 = arith.select %4, %c1_i32, %c64_i32 : i32
    %6 = vector.broadcast %5 : i32 to vector<1x128xi32>
    %7 = arith.remsi %3, %6 : vector<1x128xi32>
    %c0_i32_4 = arith.constant 0 : i32
    %8 = vector.broadcast %c0_i32_4 : i32 to vector<1x128xi32>
    %9 = arith.cmpi ne, %7, %8 : vector<1x128xi32>
    %c0_i32_5 = arith.constant 0 : i32
    %10 = vector.broadcast %c0_i32_5 : i32 to vector<1x128xi32>
    %11 = arith.cmpi slt, %7, %10 : vector<1x128xi32>
    %c0_i32_6 = arith.constant 0 : i32
    %12 = arith.cmpi slt, %5, %c0_i32_6 : i32
    %13 = vector.broadcast %12 : i1 to vector<1x128xi1>
    %14 = vector.broadcast %13 : vector<1x128xi1> to vector<1x128xi1>
    %15 = arith.xori %11, %14 : vector<1x128xi1>
    %16 = arith.andi %15, %9 : vector<1x128xi1>
    %17 = vector.broadcast %5 : i32 to vector<1x128xi32>
    %18 = arith.addi %7, %17 : vector<1x128xi32>
    %19 = arith.select %16, %18, %7 : vector<1x128xi1>, vector<1x128xi32>
    %c8_i32 = arith.constant 8 : i32
    %c0_i32_7 = arith.constant 0 : i32
    %20 = arith.cmpi eq, %c8_i32, %c0_i32_7 : i32
    %c1_i32_8 = arith.constant 1 : i32
    %21 = arith.select %20, %c1_i32_8, %c8_i32 : i32
    %22 = vector.broadcast %21 : i32 to vector<1x128xi32>
    %23 = arith.remsi %3, %22 : vector<1x128xi32>
    %c0_i32_9 = arith.constant 0 : i32
    %24 = vector.broadcast %c0_i32_9 : i32 to vector<1x128xi32>
    %25 = arith.cmpi ne, %23, %24 : vector<1x128xi32>
    %c0_i32_10 = arith.constant 0 : i32
    %26 = vector.broadcast %c0_i32_10 : i32 to vector<1x128xi32>
    %27 = arith.cmpi slt, %23, %26 : vector<1x128xi32>
    %c0_i32_11 = arith.constant 0 : i32
    %28 = arith.cmpi slt, %21, %c0_i32_11 : i32
    %29 = vector.broadcast %28 : i1 to vector<1x128xi1>
    %30 = vector.broadcast %29 : vector<1x128xi1> to vector<1x128xi1>
    %31 = arith.xori %27, %30 : vector<1x128xi1>
    %32 = arith.andi %31, %25 : vector<1x128xi1>
    %33 = vector.broadcast %21 : i32 to vector<1x128xi32>
    %34 = arith.addi %23, %33 : vector<1x128xi32>
    %35 = arith.select %32, %34, %23 : vector<1x128xi1>, vector<1x128xi32>
    %cst = arith.constant 0.000000e+00 : f32
    %36 = vector.broadcast %cst : f32 to vector<8x128xf32>
    %cst_12 = arith.constant 0.000000e+00 : f32
    %37 = vector.broadcast %cst_12 : f32 to vector<8x128xf32>
    %cst_13 = arith.constant 0.000000e+00 : f32
    %38 = vector.broadcast %cst_13 : f32 to vector<8x128xf32>
    %cst_14 = arith.constant 0.000000e+00 : f32
    %39 = vector.broadcast %cst_14 : f32 to vector<8x128xf32>
    %40 = vector.extract_strided_slice %2 {offsets = [0, 0], sizes = [8, 1], strides = [1, 1]} : vector<8x37xf32> to vector<8x1xf32>
    %41 = vector.extract_strided_slice %1 {offsets = [12, 0], sizes = [1, 128], strides = [1, 1]} : vector<16x128xf32> to vector<1x128xf32>
    %42 = vector.broadcast %40 : vector<8x1xf32> to vector<8x128xf32>
    %43 = vector.broadcast %41 : vector<1x128xf32> to vector<8x128xf32>
    %44 = arith.mulf %42, %43 : vector<8x128xf32>
    %45 = arith.addf %39, %44 : vector<8x128xf32>
    %46 = vector.extract_strided_slice %2 {offsets = [0, 9], sizes = [8, 1], strides = [1, 1]} : vector<8x37xf32> to vector<8x1xf32>
    %47 = vector.extract_strided_slice %1 {offsets = [13, 0], sizes = [1, 128], strides = [1, 1]} : vector<16x128xf32> to vector<1x128xf32>
    %48 = vector.broadcast %46 : vector<8x1xf32> to vector<8x128xf32>
    %49 = vector.broadcast %47 : vector<1x128xf32> to vector<8x128xf32>
    %50 = arith.mulf %48, %49 : vector<8x128xf32>
    %51 = arith.addf %45, %50 : vector<8x128xf32>
    %52 = vector.extract_strided_slice %2 {offsets = [0, 18], sizes = [8, 1], strides = [1, 1]} : vector<8x37xf32> to vector<8x1xf32>
    %53 = vector.extract_strided_slice %1 {offsets = [14, 0], sizes = [1, 128], strides = [1, 1]} : vector<16x128xf32> to vector<1x128xf32>
    %54 = vector.broadcast %52 : vector<8x1xf32> to vector<8x128xf32>
    %55 = vector.broadcast %53 : vector<1x128xf32> to vector<8x128xf32>
    %56 = arith.mulf %54, %55 : vector<8x128xf32>
    %57 = arith.addf %51, %56 : vector<8x128xf32>
    %58 = vector.extract_strided_slice %2 {offsets = [0, 27], sizes = [8, 1], strides = [1, 1]} : vector<8x37xf32> to vector<8x1xf32>
    %59 = vector.extract_strided_slice %1 {offsets = [15, 0], sizes = [1, 128], strides = [1, 1]} : vector<16x128xf32> to vector<1x128xf32>
    %60 = vector.broadcast %58 : vector<8x1xf32> to vector<8x128xf32>
    %61 = vector.broadcast %59 : vector<1x128xf32> to vector<8x128xf32>
    %62 = arith.mulf %60, %61 : vector<8x128xf32>
    %63 = arith.addf %57, %62 : vector<8x128xf32>
    %64 = vector.extract_strided_slice %2 {offsets = [0, 1], sizes = [8, 1], strides = [1, 1]} : vector<8x37xf32> to vector<8x1xf32>
    %65 = vector.extract_strided_slice %1 {offsets = [8, 0], sizes = [1, 128], strides = [1, 1]} : vector<16x128xf32> to vector<1x128xf32>
    %66 = vector.broadcast %64 : vector<8x1xf32> to vector<8x128xf32>
    %67 = vector.broadcast %65 : vector<1x128xf32> to vector<8x128xf32>
    %68 = arith.mulf %66, %67 : vector<8x128xf32>
    %69 = arith.addf %38, %68 : vector<8x128xf32>
    %70 = vector.extract_strided_slice %2 {offsets = [0, 10], sizes = [8, 1], strides = [1, 1]} : vector<8x37xf32> to vector<8x1xf32>
    %71 = vector.extract_strided_slice %1 {offsets = [9, 0], sizes = [1, 128], strides = [1, 1]} : vector<16x128xf32> to vector<1x128xf32>
    %72 = vector.broadcast %70 : vector<8x1xf32> to vector<8x128xf32>
    %73 = vector.broadcast %71 : vector<1x128xf32> to vector<8x128xf32>
    %74 = arith.mulf %72, %73 : vector<8x128xf32>
    %75 = arith.addf %69, %74 : vector<8x128xf32>
    %76 = vector.extract_strided_slice %2 {offsets = [0, 19], sizes = [8, 1], strides = [1, 1]} : vector<8x37xf32> to vector<8x1xf32>
    %77 = vector.extract_strided_slice %1 {offsets = [10, 0], sizes = [1, 128], strides = [1, 1]} : vector<16x128xf32> to vector<1x128xf32>
    %78 = vector.broadcast %76 : vector<8x1xf32> to vector<8x128xf32>
    %79 = vector.broadcast %77 : vector<1x128xf32> to vector<8x128xf32>
    %80 = arith.mulf %78, %79 : vector<8x128xf32>
    %81 = arith.addf %75, %80 : vector<8x128xf32>
    %82 = vector.extract_strided_slice %2 {offsets = [0, 28], sizes = [8, 1], strides = [1, 1]} : vector<8x37xf32> to vector<8x1xf32>
    %83 = vector.extract_strided_slice %1 {offsets = [11, 0], sizes = [1, 128], strides = [1, 1]} : vector<16x128xf32> to vector<1x128xf32>
    %84 = vector.broadcast %82 : vector<8x1xf32> to vector<8x128xf32>
    %85 = vector.broadcast %83 : vector<1x128xf32> to vector<8x128xf32>
    %86 = arith.mulf %84, %85 : vector<8x128xf32>
    %87 = arith.addf %81, %86 : vector<8x128xf32>
    %88 = vector.extract_strided_slice %2 {offsets = [0, 2], sizes = [8, 1], strides = [1, 1]} : vector<8x37xf32> to vector<8x1xf32>
    %89 = vector.extract_strided_slice %1 {offsets = [12, 0], sizes = [1, 128], strides = [1, 1]} : vector<16x128xf32> to vector<1x128xf32>
    %90 = vector.broadcast %88 : vector<8x1xf32> to vector<8x128xf32>
    %91 = vector.broadcast %89 : vector<1x128xf32> to vector<8x128xf32>
    %92 = arith.mulf %90, %91 : vector<8x128xf32>
    %93 = arith.addf %87, %92 : vector<8x128xf32>
    %94 = vector.extract_strided_slice %2 {offsets = [0, 11], sizes = [8, 1], strides = [1, 1]} : vector<8x37xf32> to vector<8x1xf32>
    %95 = vector.extract_strided_slice %1 {offsets = [13, 0], sizes = [1, 128], strides = [1, 1]} : vector<16x128xf32> to vector<1x128xf32>
    %96 = vector.broadcast %94 : vector<8x1xf32> to vector<8x128xf32>
    %97 = vector.broadcast %95 : vector<1x128xf32> to vector<8x128xf32>
    %98 = arith.mulf %96, %97 : vector<8x128xf32>
    %99 = arith.addf %93, %98 : vector<8x128xf32>
    %100 = vector.extract_strided_slice %2 {offsets = [0, 20], sizes = [8, 1], strides = [1, 1]} : vector<8x37xf32> to vector<8x1xf32>
    %101 = vector.extract_strided_slice %1 {offsets = [14, 0], sizes = [1, 128], strides = [1, 1]} : vector<16x128xf32> to vector<1x128xf32>
    %102 = vector.broadcast %100 : vector<8x1xf32> to vector<8x128xf32>
    %103 = vector.broadcast %101 : vector<1x128xf32> to vector<8x128xf32>
    %104 = arith.mulf %102, %103 : vector<8x128xf32>
    %105 = arith.addf %99, %104 : vector<8x128xf32>
    %106 = vector.extract_strided_slice %2 {offsets = [0, 29], sizes = [8, 1], strides = [1, 1]} : vector<8x37xf32> to vector<8x1xf32>
    %107 = vector.extract_strided_slice %1 {offsets = [15, 0], sizes = [1, 128], strides = [1, 1]} : vector<16x128xf32> to vector<1x128xf32>
    %108 = vector.broadcast %106 : vector<8x1xf32> to vector<8x128xf32>
    %109 = vector.broadcast %107 : vector<1x128xf32> to vector<8x128xf32>
    %110 = arith.mulf %108, %109 : vector<8x128xf32>
    %111 = arith.addf %105, %110 : vector<8x128xf32>
    %112 = vector.extract_strided_slice %2 {offsets = [0, 3], sizes = [8, 1], strides = [1, 1]} : vector<8x37xf32> to vector<8x1xf32>
    %113 = vector.extract_strided_slice %1 {offsets = [4, 0], sizes = [1, 128], strides = [1, 1]} : vector<16x128xf32> to vector<1x128xf32>
    %114 = vector.broadcast %112 : vector<8x1xf32> to vector<8x128xf32>
    %115 = vector.broadcast %113 : vector<1x128xf32> to vector<8x128xf32>
    %116 = arith.mulf %114, %115 : vector<8x128xf32>
    %117 = arith.addf %37, %116 : vector<8x128xf32>
    %118 = vector.extract_strided_slice %2 {offsets = [0, 12], sizes = [8, 1], strides = [1, 1]} : vector<8x37xf32> to vector<8x1xf32>
    %119 = vector.extract_strided_slice %1 {offsets = [5, 0], sizes = [1, 128], strides = [1, 1]} : vector<16x128xf32> to vector<1x128xf32>
    %120 = vector.broadcast %118 : vector<8x1xf32> to vector<8x128xf32>
    %121 = vector.broadcast %119 : vector<1x128xf32> to vector<8x128xf32>
    %122 = arith.mulf %120, %121 : vector<8x128xf32>
    %123 = arith.addf %117, %122 : vector<8x128xf32>
    %124 = vector.extract_strided_slice %2 {offsets = [0, 21], sizes = [8, 1], strides = [1, 1]} : vector<8x37xf32> to vector<8x1xf32>
    %125 = vector.extract_strided_slice %1 {offsets = [6, 0], sizes = [1, 128], strides = [1, 1]} : vector<16x128xf32> to vector<1x128xf32>
    %126 = vector.broadcast %124 : vector<8x1xf32> to vector<8x128xf32>
    %127 = vector.broadcast %125 : vector<1x128xf32> to vector<8x128xf32>
    %128 = arith.mulf %126, %127 : vector<8x128xf32>
    %129 = arith.addf %123, %128 : vector<8x128xf32>
    %130 = vector.extract_strided_slice %2 {offsets = [0, 30], sizes = [8, 1], strides = [1, 1]} : vector<8x37xf32> to vector<8x1xf32>
    %131 = vector.extract_strided_slice %1 {offsets = [7, 0], sizes = [1, 128], strides = [1, 1]} : vector<16x128xf32> to vector<1x128xf32>
    %132 = vector.broadcast %130 : vector<8x1xf32> to vector<8x128xf32>
    %133 = vector.broadcast %131 : vector<1x128xf32> to vector<8x128xf32>
    %134 = arith.mulf %132, %133 : vector<8x128xf32>
    %135 = arith.addf %129, %134 : vector<8x128xf32>
    %136 = vector.extract_strided_slice %2 {offsets = [0, 4], sizes = [8, 1], strides = [1, 1]} : vector<8x37xf32> to vector<8x1xf32>
    %137 = vector.extract_strided_slice %1 {offsets = [0, 0], sizes = [1, 128], strides = [1, 1]} : vector<16x128xf32> to vector<1x128xf32>
    %138 = vector.broadcast %136 : vector<8x1xf32> to vector<8x128xf32>
    %139 = vector.broadcast %137 : vector<1x128xf32> to vector<8x128xf32>
    %140 = arith.mulf %138, %139 : vector<8x128xf32>
    %141 = arith.addf %36, %140 : vector<8x128xf32>
    %142 = vector.extract_strided_slice %2 {offsets = [0, 13], sizes = [8, 1], strides = [1, 1]} : vector<8x37xf32> to vector<8x1xf32>
    %143 = vector.extract_strided_slice %1 {offsets = [1, 0], sizes = [1, 128], strides = [1, 1]} : vector<16x128xf32> to vector<1x128xf32>
    %144 = vector.broadcast %142 : vector<8x1xf32> to vector<8x128xf32>
    %145 = vector.broadcast %143 : vector<1x128xf32> to vector<8x128xf32>
    %146 = arith.mulf %144, %145 : vector<8x128xf32>
    %147 = arith.addf %141, %146 : vector<8x128xf32>
    %148 = vector.extract_strided_slice %2 {offsets = [0, 22], sizes = [8, 1], strides = [1, 1]} : vector<8x37xf32> to vector<8x1xf32>
    %149 = vector.extract_strided_slice %1 {offsets = [2, 0], sizes = [1, 128], strides = [1, 1]} : vector<16x128xf32> to vector<1x128xf32>
    %150 = vector.broadcast %148 : vector<8x1xf32> to vector<8x128xf32>
    %151 = vector.broadcast %149 : vector<1x128xf32> to vector<8x128xf32>
    %152 = arith.mulf %150, %151 : vector<8x128xf32>
    %153 = arith.addf %147, %152 : vector<8x128xf32>
    %154 = vector.extract_strided_slice %2 {offsets = [0, 31], sizes = [8, 1], strides = [1, 1]} : vector<8x37xf32> to vector<8x1xf32>
    %155 = vector.extract_strided_slice %1 {offsets = [3, 0], sizes = [1, 128], strides = [1, 1]} : vector<16x128xf32> to vector<1x128xf32>
    %156 = vector.broadcast %154 : vector<8x1xf32> to vector<8x128xf32>
    %157 = vector.broadcast %155 : vector<1x128xf32> to vector<8x128xf32>
    %158 = arith.mulf %156, %157 : vector<8x128xf32>
    %159 = arith.addf %153, %158 : vector<8x128xf32>
    %160 = vector.extract_strided_slice %2 {offsets = [0, 5], sizes = [8, 1], strides = [1, 1]} : vector<8x37xf32> to vector<8x1xf32>
    %161 = vector.extract_strided_slice %1 {offsets = [4, 0], sizes = [1, 128], strides = [1, 1]} : vector<16x128xf32> to vector<1x128xf32>
    %162 = vector.broadcast %160 : vector<8x1xf32> to vector<8x128xf32>
    %163 = vector.broadcast %161 : vector<1x128xf32> to vector<8x128xf32>
    %164 = arith.mulf %162, %163 : vector<8x128xf32>
    %165 = arith.addf %159, %164 : vector<8x128xf32>
    %166 = vector.extract_strided_slice %2 {offsets = [0, 14], sizes = [8, 1], strides = [1, 1]} : vector<8x37xf32> to vector<8x1xf32>
    %167 = vector.extract_strided_slice %1 {offsets = [5, 0], sizes = [1, 128], strides = [1, 1]} : vector<16x128xf32> to vector<1x128xf32>
    %168 = vector.broadcast %166 : vector<8x1xf32> to vector<8x128xf32>
    %169 = vector.broadcast %167 : vector<1x128xf32> to vector<8x128xf32>
    %170 = arith.mulf %168, %169 : vector<8x128xf32>
    %171 = arith.addf %165, %170 : vector<8x128xf32>
    %172 = vector.extract_strided_slice %2 {offsets = [0, 23], sizes = [8, 1], strides = [1, 1]} : vector<8x37xf32> to vector<8x1xf32>
    %173 = vector.extract_strided_slice %1 {offsets = [6, 0], sizes = [1, 128], strides = [1, 1]} : vector<16x128xf32> to vector<1x128xf32>
    %174 = vector.broadcast %172 : vector<8x1xf32> to vector<8x128xf32>
    %175 = vector.broadcast %173 : vector<1x128xf32> to vector<8x128xf32>
    %176 = arith.mulf %174, %175 : vector<8x128xf32>
    %177 = arith.addf %171, %176 : vector<8x128xf32>
    %178 = vector.extract_strided_slice %2 {offsets = [0, 32], sizes = [8, 1], strides = [1, 1]} : vector<8x37xf32> to vector<8x1xf32>
    %179 = vector.extract_strided_slice %1 {offsets = [7, 0], sizes = [1, 128], strides = [1, 1]} : vector<16x128xf32> to vector<1x128xf32>
    %180 = vector.broadcast %178 : vector<8x1xf32> to vector<8x128xf32>
    %181 = vector.broadcast %179 : vector<1x128xf32> to vector<8x128xf32>
    %182 = arith.mulf %180, %181 : vector<8x128xf32>
    %183 = arith.addf %177, %182 : vector<8x128xf32>
    %184 = vector.extract_strided_slice %2 {offsets = [0, 6], sizes = [8, 1], strides = [1, 1]} : vector<8x37xf32> to vector<8x1xf32>
    %185 = vector.extract_strided_slice %1 {offsets = [12, 0], sizes = [1, 128], strides = [1, 1]} : vector<16x128xf32> to vector<1x128xf32>
    %186 = vector.broadcast %184 : vector<8x1xf32> to vector<8x128xf32>
    %187 = vector.broadcast %185 : vector<1x128xf32> to vector<8x128xf32>
    %188 = arith.mulf %186, %187 : vector<8x128xf32>
    %189 = arith.addf %135, %188 : vector<8x128xf32>
    %190 = vector.extract_strided_slice %2 {offsets = [0, 15], sizes = [8, 1], strides = [1, 1]} : vector<8x37xf32> to vector<8x1xf32>
    %191 = vector.extract_strided_slice %1 {offsets = [13, 0], sizes = [1, 128], strides = [1, 1]} : vector<16x128xf32> to vector<1x128xf32>
    %192 = vector.broadcast %190 : vector<8x1xf32> to vector<8x128xf32>
    %193 = vector.broadcast %191 : vector<1x128xf32> to vector<8x128xf32>
    %194 = arith.mulf %192, %193 : vector<8x128xf32>
    %195 = arith.addf %189, %194 : vector<8x128xf32>
    %196 = vector.extract_strided_slice %2 {offsets = [0, 24], sizes = [8, 1], strides = [1, 1]} : vector<8x37xf32> to vector<8x1xf32>
    %197 = vector.extract_strided_slice %1 {offsets = [14, 0], sizes = [1, 128], strides = [1, 1]} : vector<16x128xf32> to vector<1x128xf32>
    %198 = vector.broadcast %196 : vector<8x1xf32> to vector<8x128xf32>
    %199 = vector.broadcast %197 : vector<1x128xf32> to vector<8x128xf32>
    %200 = arith.mulf %198, %199 : vector<8x128xf32>
    %201 = arith.addf %195, %200 : vector<8x128xf32>
    %202 = vector.extract_strided_slice %2 {offsets = [0, 33], sizes = [8, 1], strides = [1, 1]} : vector<8x37xf32> to vector<8x1xf32>
    %203 = vector.extract_strided_slice %1 {offsets = [15, 0], sizes = [1, 128], strides = [1, 1]} : vector<16x128xf32> to vector<1x128xf32>
    %204 = vector.broadcast %202 : vector<8x1xf32> to vector<8x128xf32>
    %205 = vector.broadcast %203 : vector<1x128xf32> to vector<8x128xf32>
    %206 = arith.mulf %204, %205 : vector<8x128xf32>
    %207 = arith.addf %201, %206 : vector<8x128xf32>
    %208 = vector.extract_strided_slice %2 {offsets = [0, 7], sizes = [8, 1], strides = [1, 1]} : vector<8x37xf32> to vector<8x1xf32>
    %209 = vector.extract_strided_slice %1 {offsets = [8, 0], sizes = [1, 128], strides = [1, 1]} : vector<16x128xf32> to vector<1x128xf32>
    %210 = vector.broadcast %208 : vector<8x1xf32> to vector<8x128xf32>
    %211 = vector.broadcast %209 : vector<1x128xf32> to vector<8x128xf32>
    %212 = arith.mulf %210, %211 : vector<8x128xf32>
    %213 = arith.addf %183, %212 : vector<8x128xf32>
    %214 = vector.extract_strided_slice %2 {offsets = [0, 16], sizes = [8, 1], strides = [1, 1]} : vector<8x37xf32> to vector<8x1xf32>
    %215 = vector.extract_strided_slice %1 {offsets = [9, 0], sizes = [1, 128], strides = [1, 1]} : vector<16x128xf32> to vector<1x128xf32>
    %216 = vector.broadcast %214 : vector<8x1xf32> to vector<8x128xf32>
    %217 = vector.broadcast %215 : vector<1x128xf32> to vector<8x128xf32>
    %218 = arith.mulf %216, %217 : vector<8x128xf32>
    %219 = arith.addf %213, %218 : vector<8x128xf32>
    %220 = vector.extract_strided_slice %2 {offsets = [0, 25], sizes = [8, 1], strides = [1, 1]} : vector<8x37xf32> to vector<8x1xf32>
    %221 = vector.extract_strided_slice %1 {offsets = [10, 0], sizes = [1, 128], strides = [1, 1]} : vector<16x128xf32> to vector<1x128xf32>
    %222 = vector.broadcast %220 : vector<8x1xf32> to vector<8x128xf32>
    %223 = vector.broadcast %221 : vector<1x128xf32> to vector<8x128xf32>
    %224 = arith.mulf %222, %223 : vector<8x128xf32>
    %225 = arith.addf %219, %224 : vector<8x128xf32>
    %226 = vector.extract_strided_slice %2 {offsets = [0, 34], sizes = [8, 1], strides = [1, 1]} : vector<8x37xf32> to vector<8x1xf32>
    %227 = vector.extract_strided_slice %1 {offsets = [11, 0], sizes = [1, 128], strides = [1, 1]} : vector<16x128xf32> to vector<1x128xf32>
    %228 = vector.broadcast %226 : vector<8x1xf32> to vector<8x128xf32>
    %229 = vector.broadcast %227 : vector<1x128xf32> to vector<8x128xf32>
    %230 = arith.mulf %228, %229 : vector<8x128xf32>
    %231 = arith.addf %225, %230 : vector<8x128xf32>
    %232 = vector.extract_strided_slice %2 {offsets = [0, 8], sizes = [8, 1], strides = [1, 1]} : vector<8x37xf32> to vector<8x1xf32>
    %233 = vector.extract_strided_slice %1 {offsets = [12, 0], sizes = [1, 128], strides = [1, 1]} : vector<16x128xf32> to vector<1x128xf32>
    %234 = vector.broadcast %232 : vector<8x1xf32> to vector<8x128xf32>
    %235 = vector.broadcast %233 : vector<1x128xf32> to vector<8x128xf32>
    %236 = arith.mulf %234, %235 : vector<8x128xf32>
    %237 = arith.addf %231, %236 : vector<8x128xf32>
    %238 = vector.extract_strided_slice %2 {offsets = [0, 17], sizes = [8, 1], strides = [1, 1]} : vector<8x37xf32> to vector<8x1xf32>
    %239 = vector.extract_strided_slice %1 {offsets = [13, 0], sizes = [1, 128], strides = [1, 1]} : vector<16x128xf32> to vector<1x128xf32>
    %240 = vector.broadcast %238 : vector<8x1xf32> to vector<8x128xf32>
    %241 = vector.broadcast %239 : vector<1x128xf32> to vector<8x128xf32>
    %242 = arith.mulf %240, %241 : vector<8x128xf32>
    %243 = arith.addf %237, %242 : vector<8x128xf32>
    %244 = vector.extract_strided_slice %2 {offsets = [0, 26], sizes = [8, 1], strides = [1, 1]} : vector<8x37xf32> to vector<8x1xf32>
    %245 = vector.extract_strided_slice %1 {offsets = [14, 0], sizes = [1, 128], strides = [1, 1]} : vector<16x128xf32> to vector<1x128xf32>
    %246 = vector.broadcast %244 : vector<8x1xf32> to vector<8x128xf32>
    %247 = vector.broadcast %245 : vector<1x128xf32> to vector<8x128xf32>
    %248 = arith.mulf %246, %247 : vector<8x128xf32>
    %249 = arith.addf %243, %248 : vector<8x128xf32>
    %250 = vector.extract_strided_slice %2 {offsets = [0, 35], sizes = [8, 1], strides = [1, 1]} : vector<8x37xf32> to vector<8x1xf32>
    %251 = vector.extract_strided_slice %1 {offsets = [15, 0], sizes = [1, 128], strides = [1, 1]} : vector<16x128xf32> to vector<1x128xf32>
    %252 = vector.broadcast %250 : vector<8x1xf32> to vector<8x128xf32>
    %253 = vector.broadcast %251 : vector<1x128xf32> to vector<8x128xf32>
    %254 = arith.mulf %252, %253 : vector<8x128xf32>
    %255 = arith.addf %249, %254 : vector<8x128xf32>
    %c1_i32_15 = arith.constant 1 : i32
    %256 = tpu.dynamic_rotate %207 by %c1_i32_15 dim 1 : vector<8x128xf32>, i32 -> vector<8x128xf32>
    %c1_i32_16 = arith.constant 1 : i32
    %257 = vector.broadcast %c1_i32_16 : i32 to vector<1x128xi32>
    %258 = arith.cmpi sge, %19, %257 : vector<1x128xi32>
    %c0_i32_17 = arith.constant 0 : i32
    %259 = vector.broadcast %c0_i32_17 : i32 to vector<1x128xi32>
    %260 = arith.cmpi ne, %35, %259 : vector<1x128xi32>
    %261 = arith.andi %258, %260 : vector<1x128xi1>
    %cst_18 = arith.constant 0.000000e+00 : f32
    %262 = vector.shape_cast %261 : vector<1x128xi1> to vector<1x128xi1>
    %263 = vector.broadcast %262 : vector<1x128xi1> to vector<8x128xi1>
    %264 = vector.broadcast %cst_18 : f32 to vector<8x128xf32>
    %265 = arith.select %263, %256, %264 : vector<8x128xi1>, vector<8x128xf32>
    %266 = arith.addf %255, %265 : vector<8x128xf32>
    %c8_i32_19 = arith.constant 8 : i32
    %267 = tpu.dynamic_rotate %111 by %c8_i32_19 dim 1 : vector<8x128xf32>, i32 -> vector<8x128xf32>
    %c8_i32_20 = arith.constant 8 : i32
    %268 = vector.broadcast %c8_i32_20 : i32 to vector<1x128xi32>
    %269 = arith.cmpi sge, %19, %268 : vector<1x128xi32>
    %cst_21 = arith.constant 0.000000e+00 : f32
    %270 = vector.shape_cast %269 : vector<1x128xi1> to vector<1x128xi1>
    %271 = vector.broadcast %270 : vector<1x128xi1> to vector<8x128xi1>
    %272 = vector.broadcast %cst_21 : f32 to vector<8x128xf32>
    %273 = arith.select %271, %267, %272 : vector<8x128xi1>, vector<8x128xf32>
    %274 = arith.addf %266, %273 : vector<8x128xf32>
    %c9_i32 = arith.constant 9 : i32
    %275 = tpu.dynamic_rotate %63 by %c9_i32 dim 1 : vector<8x128xf32>, i32 -> vector<8x128xf32>
    %c9_i32_22 = arith.constant 9 : i32
    %276 = vector.broadcast %c9_i32_22 : i32 to vector<1x128xi32>
    %277 = arith.cmpi sge, %19, %276 : vector<1x128xi32>
    %c0_i32_23 = arith.constant 0 : i32
    %278 = vector.broadcast %c0_i32_23 : i32 to vector<1x128xi32>
    %279 = arith.cmpi ne, %35, %278 : vector<1x128xi32>
    %280 = arith.andi %277, %279 : vector<1x128xi1>
    %cst_24 = arith.constant 0.000000e+00 : f32
    %281 = vector.shape_cast %280 : vector<1x128xi1> to vector<1x128xi1>
    %282 = vector.broadcast %281 : vector<1x128xi1> to vector<8x128xi1>
    %283 = vector.broadcast %cst_24 : f32 to vector<8x128xf32>
    %284 = arith.select %282, %275, %283 : vector<8x128xi1>, vector<8x128xf32>
    %285 = arith.addf %274, %284 : vector<8x128xf32>
    %286 = vector.extract_strided_slice %2 {offsets = [0, 36], sizes = [8, 1], strides = [1, 1]} : vector<8x37xf32> to vector<8x1xf32>
    %287 = vector.broadcast %286 : vector<8x1xf32> to vector<8x128xf32>
    %288 = arith.addf %285, %287 : vector<8x128xf32>
    %c0_25 = arith.constant 0 : index
    %c0_26 = arith.constant 0 : index
    %c0_27 = arith.constant 0 : index
    %289 = vector.load %arg3[%c0_25, %c0_26, %c0_27] : memref<1x8x128xf32, #tpu.memory_space<vmem>>, vector<1x8x128xf32>
    %290 = vector.shape_cast %289 : vector<1x8x128xf32> to vector<8x128xf32>
    %291 = vector.shape_cast %288 : vector<8x128xf32> to vector<1x8x128xf32>
    tpu.vector_store %arg3[%c0_25, %c0_26, %c0_27], %291 {strides = array<i32>} : memref<1x8x128xf32, #tpu.memory_space<vmem>>, vector<1x8x128xf32>,
    return
  }
  func.func @transform_0(%arg0: i32) -> (i32, i32, i32) {
    %c0_i32 = arith.constant 0 : i32
    %c0_i32_0 = arith.constant 0 : i32
    %c0_i32_1 = arith.constant 0 : i32
    return %arg0, %c0_i32, %c0_i32_0 : i32, i32, i32
  }
  func.func @transform_1(%arg0: i32) -> (i32, i32) {
    %c0_i32 = arith.constant 0 : i32
    %c0_i32_0 = arith.constant 0 : i32
    %c0_i32_1 = arith.constant 0 : i32
    return %c0_i32, %c0_i32_0 : i32, i32
  }
  func.func @transform_2(%arg0: i32) -> (i32, i32, i32) {
    %c0_i32 = arith.constant 0 : i32
    %c0_i32_0 = arith.constant 0 : i32
    %c0_i32_1 = arith.constant 0 : i32
    return %arg0, %c0_i32, %c0_i32_0 : i32, i32, i32
  }
}

</mosaic_0001>

<bundles_post_ra>
// kernel: tpu_custom_call.1
= control target key start
LH: loop header
LB: loop body
LE: loop exit
PB: predicated region body
PF: predicated region fallthrough
CT: control target
= control target key end

     0   :  { %7 = vsyncpa [#allocation3], 0  ;;  %s743_s0 = inlined_call_operand.hbm [shape: f32[1,16,128], index: 0, kind: input, shape index: {}]   ;;  %s744_s1 = inlined_call_operand.hbm [shape: f32[8,37], index: 1, kind: input, shape index: {}]   ;;  %s745_s2 = inlined_call_operand.hbm [shape: f32[1,8,128], index: 2, kind: output, shape index: {}]  }
   0x1   :  { %8 = vsyncpa [#allocation6], 0 }
   0x2   :  { %9 = vsyncpa [#allocation4], 0  ;;  %s541_s9 = smov [#allocation2]  }
   0x3   :  { %s15_s10 = sshll.u32 %s541_s9, 4  ;;  %s16_s10 = int_to_ptr.vmem [resolvable:$true] %s15_s10 }
   0x4   :  { %s483_s11 = scalar_lea.vmem %s16_s10, 256  ;;  %p488_p1 = scmp.lt.s32.totalorder %s16_s10, %s16_s10 }
   0x5   :  { %p484_p0 = scmp.ne.s32.totalorder %s16_s10, %s483_s11  ;;  %p489_p2 = scmp.lt.s32.totalorder %s483_s11, %s483_s11 }
   0x7   :  { %p490_p3 = por %p489_p2, %p488_p1 }
   0x9   :  { %p491_p4 = pnand %p490_p3, %p484_p0 }
   0xb   :  { %494 = shalt.err (!%p491_p4)
}
   0xc   :  { %s542_s12 = smov 128   ;;  %s543_s13 = smov 8  }
   0xd   :  { %21 = dma.hbm_to_vmem [thread:$0]  %s743_s0, 256, %s16_s10, [#allocation3], %s542_s12, %s542_s12, %s543_s13  }
   0xe   :  { %s544_s16 = smov [#allocation5]  }
   0xf   :  { %s28_s17 = sshll.u32 %s544_s16, 4  ;;  %s29_s17 = int_to_ptr.vmem [resolvable:$true] %s28_s17 }
  0x10   :  { %s503_s18 = scalar_lea.vmem %s29_s17, 128  ;;  %p508_p6 = scmp.lt.s32.totalorder %s29_s17, %s29_s17 }
  0x11   :  { %p504_p5 = scmp.ne.s32.totalorder %s29_s17, %s503_s18  ;;  %p509_p7 = scmp.lt.s32.totalorder %s503_s18, %s503_s18 }
  0x13   :  { %p510_p8 = por %p509_p7, %p508_p6 }
  0x15   :  { %p511_p9 = pnand %p510_p8, %p504_p5 }
  0x17   :  { %514 = shalt.err (!%p511_p9)
}
  0x18   :  { %31 = dma.hbm_to_vmem [thread:$0]  %s744_s1, 128, %s29_s17, [#allocation6]  }
  0x19   :  { %535 = dma.done.wait [#allocation3], 256  }
  0x1a   :  { %536 = vsyncadd [#allocation3], 4294967040 }
  0x1b   :  { %537 = dma.done.wait [#allocation6], 128  }
  0x1c   :  { %538 = vsyncadd [#allocation6], 4294967168  ;;  %v545_v0 = vmov 3   ;;  %v546_v1 = vmov 0   ;;  %v607_v2 = vld [vmem:[#allocation5] sm:$0xff]  ;;  %v547_v3 = vmov 12   ;;  %v41_v43 = vlaneseq }
  0x1d   :  { %440 = vset.pattern.permute.xlu1 %v545_v0  ;;  %438 = vset.pattern.permute.xlu0 %v546_v1  ;;  %v548_v4 = vmov 9   ;;  %v549_v5 = vmov 1   ;;  %v550_v6 = vmov 10   ;;  %v551_v7 = vmov 21   ;;  %v654_v51 = vld [vmem:[#allocation2] sm:$0xff]  ;;  %v39_v60 = vld [vmem:[#allocation2 + $0x8] sm:$0xff] }
  0x1e   :  { %173 = vperm.xlu1 %440, %v607_v2   ;;  %69 = vperm.xlu0 %438, %v607_v2   ;;  %v552_v8 = vmov 30   ;;  %v553_v9 = vmov 19   ;;  %v554_v10 = vmov 2   ;;  %v555_v11 = vmov 28   ;;  %s582_s0 = smov 1   ;;  %s583_s1 = smov 9  }
  0x1f   :  { %v556_v12 = vmov 24   ;;  %v557_v13 = vmov 6   ;;  %v558_v14 = vmov 18   ;;  %v559_v15 = vmov 15   ;;  %s584_s21 = smov [#allocation7]  }
  0x20   :  { %v560_v16 = vmov 4   ;;  %v561_v17 = vmov 11   ;;  %v562_v18 = vmov 31   ;;  %v563_v19 = vmov 20   ;;  %s384_s22 = sshll.u32 %s584_s21, 4  ;;  %s385_s22 = int_to_ptr.vmem [resolvable:$true] %s384_s22 }
  0x21   :  { %v564_v20 = vmov 23   ;;  %v565_v21 = vmov 33   ;;  %v566_v22 = vmov 16   ;;  %v567_v23 = vmov 29   ;;  %s515_s23 = scalar_lea.vmem %s385_s22, 128  ;;  %p520_p11 = scmp.lt.s32.totalorder %s385_s22, %s385_s22 }
  0x22   :  { %441 = vset.pattern.permute.xlu1 %v547_v3  ;;  %439 = vset.pattern.permute.xlu0 %v548_v4  ;;  %v568_v24 = vmov 8   ;;  %v569_v25 = vmov 27   ;;  %v570_v26 = vmov 35   ;;  %v571_v27 = vmov 13   ;;  %p516_p10 = scmp.ne.s32.totalorder %s385_s22, %s515_s23  ;;  %p521_p12 = scmp.lt.s32.totalorder %s515_s23, %s515_s23 }
  0x23   :  { %183 = vperm.xlu1 %441, %v607_v2   ;;  %79 = vperm.xlu0 %439, %v607_v2   ;;  %v572_v28 = vmov 36   ;;  %v573_v29 = vmov 22   ;;  %v574_v30 = vmov 5   ;;  %v575_v31 = vmov 14  }
  0x24   :  { %v576_v32 = vmov 32   ;;  %v577_v33 = vmov 7   ;;  %v578_v34 = vmov 25   ;;  %v579_v35 = vmov 34   ;;  %p522_p13 = por %p521_p12, %p520_p11 }
  0x25   :  { %v580_v36 = vmov 17   ;;  %v581_v37 = vmov 26   ;;  %v649_v45 = vshrl.u32 %v41_v43, 7 }
  0x26   :  { %p523_p0 = pnand %p522_p13, %p516_p10 }
  0x27   :  { %442 = vset.pattern.permute.xlu1 %v549_v5  ;;  %443 = vset.pattern.permute.xlu0 %v550_v6  ;;  %v84_v47 = vsub.s32 5, %v649_v45  ;;  %v74_v49 = vsub.s32 4, %v649_v45  ;;  %v94_v50 = vsub.s32 6, %v649_v45  ;;  %v104_v57 = vsub.s32 7, %v649_v45 }
  0x28   :  { %109 = vperm.xlu1 %442, %v607_v2   ;;  %119 = vperm.xlu0 %443, %v607_v2   ;;  %v114_v58 = vsub.s32 0, %v649_v45  ;;  %v124_v59 = vsub.s32 1, %v649_v45  ;;  %v134_v63 = vsub.s32 2, %v649_v45  ;;  %v144_v6 = vsub.s32 3, %v649_v45 }
  0x29   :  { %v657_v52 = vrot.slane %v654_v51, %v84_v47  ;;  %v660_v55 = vrot.slane %v654_v51, %v74_v49  ;;  %v663_v56 = vrot.slane %v654_v51, %v94_v50 }
  0x2a   :  { %v677_v4 = vrot.slane %v39_v60, %v114_v58  ;;  %v681_v5 = vrot.slane %v39_v60, %v124_v59 }
  0x2c   :  { %444 = vset.pattern.permute.xlu1 %v551_v7  ;;  %446 = vset.pattern.permute.xlu0 %v552_v8  ;;  %v686_v8 = vrot.slane %v39_v60, %v134_v63 }
  0x2d   :  { %193 = vperm.xlu1 %444, %v607_v2   ;;  %203 = vperm.xlu0 %446, %v607_v2  }
  0x31   :  { %445 = vset.pattern.permute.xlu1 %v553_v9  ;;  %449 = vset.pattern.permute.xlu0 %v554_v10  ;;  %v688_v9 = vrot.slane %v39_v60, %v74_v49 }
  0x32   :  { %129 = vperm.xlu1 %445, %v607_v2   ;;  %149 = vperm.xlu0 %449, %v607_v2  }
  0x36   :  { %447 = vset.pattern.permute.xlu1 %v555_v11  ;;  %452 = vset.pattern.permute.xlu0 %v556_v12 }
  0x37   :  { %139 = vperm.xlu1 %447, %v607_v2   ;;  %289 = vperm.xlu0 %452, %v607_v2  }
  0x3b   :  { %448 = vset.pattern.permute.xlu1 %v557_v13  ;;  %455 = vset.pattern.permute.xlu0 %v558_v14 }
  0x3c   :  { %277 = vperm.xlu1 %448, %v607_v2   ;;  %89 = vperm.xlu0 %455, %v607_v2  }
  0x40   :  { %450 = vset.pattern.permute.xlu1 %v559_v15  ;;  %458 = vset.pattern.permute.xlu0 %v560_v16  ;;  %v693_v15 = vrot.slane %v39_v60, %v144_v6 }
  0x41   :  { %283 = vperm.xlu1 %450, %v607_v2   ;;  %213 = vperm.xlu0 %458, %v607_v2  }
  0x45   :  { %451 = vset.pattern.permute.xlu1 %v561_v17  ;;  %461 = vset.pattern.permute.xlu0 %v562_v18  ;;  %v695_v17 = vrot.slane %v39_v60, %v84_v47 }
  0x46   :  { %155 = vperm.xlu1 %451, %v607_v2   ;;  %243 = vperm.xlu0 %461, %v607_v2  }
  0x4a   :  { %453 = vset.pattern.permute.xlu1 %v563_v19  ;;  %464 = vset.pattern.permute.xlu0 %v564_v20 }
  0x4b   :  { %161 = vperm.xlu1 %453, %v607_v2   ;;  %265 = vperm.xlu0 %464, %v607_v2  }
  0x4f   :  { %454 = vset.pattern.permute.xlu1 %v565_v21  ;;  %467 = vset.pattern.permute.xlu0 %v566_v22 }
  0x50   :  { %295 = vperm.xlu1 %454, %v607_v2   ;;  %307 = vperm.xlu0 %467, %v607_v2  }
  0x54   :  { %456 = vset.pattern.permute.xlu1 %v567_v23  ;;  %470 = vset.pattern.permute.xlu0 %v568_v24  ;;  %v701_v24 = vrot.slane %v39_v60, %v94_v50 }
  0x55   :  { %167 = vperm.xlu1 %456, %v607_v2   ;;  %325 = vperm.xlu0 %470, %v607_v2  }
  0x59   :  { %457 = vset.pattern.permute.xlu1 %v569_v25  ;;  %473 = vset.pattern.permute.xlu0 %v570_v26 }
  0x5a   :  { %99 = vperm.xlu1 %457, %v607_v2   ;;  %343 = vperm.xlu0 %473, %v607_v2  }
  0x5e   :  { %459 = vset.pattern.permute.xlu1 %v571_v27  ;;  %474 = vset.pattern.permute.xlu0 %v572_v28 }
  0x5f   :  { %223 = vperm.xlu1 %459, %v607_v2   ;;  %373 = vperm.xlu0 %474, %v607_v2  }
  0x63   :  { %460 = vset.pattern.permute.xlu1 %v573_v29  ;;  %v703_v29 = vrot.slane %v39_v60, %v104_v57 }
  0x64   :  { %233 = vperm.xlu1 %460, %v607_v2  }
  0x68   :  { %462 = vset.pattern.permute.xlu1 %v574_v30 }
  0x69   :  { %253 = vperm.xlu1 %462, %v607_v2  }
  0x6d   :  { %463 = vset.pattern.permute.xlu1 %v575_v31 }
  0x6e   :  { %259 = vperm.xlu1 %463, %v607_v2  }
  0x72   :  { %465 = vset.pattern.permute.xlu1 %v576_v32 }
  0x73   :  { %271 = vperm.xlu1 %465, %v607_v2  }
  0x77   :  { %466 = vset.pattern.permute.xlu1 %v577_v33 }
  0x78   :  { %301 = vperm.xlu1 %466, %v607_v2  }
  0x7c   :  { %468 = vset.pattern.permute.xlu1 %v578_v34 }
  0x7d   :  { %313 = vperm.xlu1 %468, %v607_v2  }
  0x81   :  { %469 = vset.pattern.permute.xlu1 %v579_v35 }
  0x82   :  { %319 = vperm.xlu1 %469, %v607_v2  }
  0x86   :  { %471 = vset.pattern.permute.xlu1 %v580_v36 }
  0x87   :  { %331 = vperm.xlu1 %471, %v607_v2  }
  0x8b   :  { %472 = vset.pattern.permute.xlu1 %v581_v37 }
  0x8c   :  { %337 = vperm.xlu1 %472, %v607_v2   ;;  %v673_v2 = vrot.slane %v654_v51, %v104_v57 }
  0x99   :  { %v174_v38 = vpop.permute.xlu1 %173  ;;  %v646_v42 = vpop.permute.xlu0 %69 }
  0x9a   :  { %v180_v0 = vmul.f32 %v660_v55, %v174_v38  ;;  %v76_v47 = vmul.f32 %v688_v9, %v646_v42  ;;  %v219_v42 = vrot.slane %v654_v51, %v114_v58 }
  0x9e   :  { %v184_v39 = vpop.permute.xlu1 %183  ;;  %v80_v46 = vpop.permute.xlu0 %79 }
  0x9f   :  { %v190_v61 = vmul.f32 %v657_v52, %v184_v39 }
  0xa1   :  { %v191_v7 = vadd.f32 %v190_v61, %v180_v0 }
  0xa3   :  { %v110_v40 = vpop.permute.xlu1 %109  ;;  %v120_v53 = vpop.permute.xlu0 %119 }
  0xa4   :  { %v116_v12 = vmul.f32 %v677_v4, %v110_v40  ;;  %v126_v13 = vmul.f32 %v681_v5, %v120_v53 }
  0xa6   :  { %v127_v22 = vadd.f32 %v126_v13, %v116_v12  ;;  %v239_v12 = vrot.slane %v654_v51, %v134_v63  ;;  %v249_v13 = vrot.slane %v654_v51, %v144_v6 }
  0xa8   :  { %v194_v41 = vpop.permute.xlu1 %193  ;;  %v204_v62 = vpop.permute.xlu0 %203 }
  0xa9   :  { %v200_v1 = vmul.f32 %v663_v56, %v194_v41  ;;  %v210_v11 = vmul.f32 %v673_v2, %v204_v62 }
  0xab   :  { %v201_v10 = vadd.f32 %v200_v1, %v191_v7 }
  0xad   :  { %v130_v44 = vpop.permute.xlu1 %129  ;;  %v150_v14 = vpop.permute.xlu0 %149  ;;  %v211_v20 = vadd.f32 %v210_v11, %v201_v10 }
  0xae   :  { %v136_v19 = vmul.f32 %v686_v8, %v130_v44  ;;  %v152_v32 = vmul.f32 %v150_v14, %v688_v9 }
  0xb0   :  { %v137_v27 = vadd.f32 %v136_v19, %v127_v22 }
  0xb2   :  { %v140_v48 = vpop.permute.xlu1 %139  ;;  %v290_v28 = vpop.permute.xlu0 %289 }
  0xb3   :  { %v146_v23 = vmul.f32 %v693_v15, %v140_v48  ;;  %v292_v30 = vmul.f32 %v290_v28, %v701_v24  ;;  %v86_v48 = vmul.f32 %v695_v17, %v80_v46  ;;  %v229_v46 = vrot.slane %v654_v51, %v124_v59 }
  0xb5   :  { %v147_v33 = vadd.f32 %v146_v23, %v137_v27  ;;  %v87_v60 = vadd.f32 %v86_v48, %v76_v47 }
  0xb7   :  { %v278_v54 = vpop.permute.xlu1 %277  ;;  %v153_v38 = vadd.f32 %v152_v32, %v147_v33  ;;  %v90_v41 = vpop.permute.xlu0 %89 }
  0xb8   :  { %v280_v18 = vmul.f32 %v278_v54, %v688_v9  ;;  %v96_v54 = vmul.f32 %v701_v24, %v90_v41 }
  0xba   :  { %v281_v25 = vadd.f32 %v280_v18, %v211_v20  ;;  %v97_v62 = vadd.f32 %v96_v54, %v87_v60  ;;  %v42_v54 = vand.u32 127, %v41_v43 }
  0xbc   :  { %v284_v3 = vpop.permute.xlu1 %283  ;;  %v214_v1 = vpop.permute.xlu0 %213 }
  0xbd   :  { %v286_v21 = vmul.f32 %v284_v3, %v695_v17  ;;  %v220_v10 = vmul.f32 %v219_v42, %v214_v1 }
  0xbf   :  { %v287_v31 = vadd.f32 %v286_v21, %v281_v25 }
  0xc1   :  { %v156_v16 = vpop.permute.xlu1 %155  ;;  %v293_v36 = vadd.f32 %v292_v30, %v287_v31  ;;  %v244_v14 = vpop.permute.xlu0 %243 }
  0xc2   :  { %v158_v34 = vmul.f32 %v156_v16, %v695_v17  ;;  %v250_v19 = vmul.f32 %v249_v13, %v244_v14 }
  0xc4   :  { %v159_v44 = vadd.f32 %v158_v34, %v153_v38 }
  0xc6   :  { %v162_v26 = vpop.permute.xlu1 %161  ;;  %v266_v23 = vpop.permute.xlu0 %265 }
  0xc7   :  { %v164_v39 = vmul.f32 %v162_v26, %v701_v24  ;;  %v268_v45 = vmul.f32 %v266_v23, %v663_v56 }
  0xc9   :  { %v165_v50 = vadd.f32 %v164_v39, %v159_v44 }
  0xcb   :  { %v296_v35 = vpop.permute.xlu1 %295  ;;  %v308_v30 = vpop.permute.xlu0 %307 }
  0xcc   :  { %v298_v37 = vmul.f32 %v296_v35, %v703_v29  ;;  %v310_v34 = vmul.f32 %v308_v30, %v681_v5 }
  0xce   :  { %v299_v40 = vadd.f32 %v298_v37, %v293_v36 }
  0xd0   :  { %v168_v49 = vpop.permute.xlu1 %167  ;;  %348 = vrot.lane.b32.xlu1 %v299_v40, %s582_s0 }
  0xd1   :  { %v170_v53 = vmul.f32 %v168_v49, %v703_v29 }
  0xd3   :  { %v171_v57 = vadd.f32 %v170_v53, %v165_v50 }
  0xd5   :  { %v100_v61 = vpop.permute.xlu1 %99  ;;  %357 = vrot.lane.b32.xlu1 %v171_v57, %s543_s13  ;;  %v47_v57 = vand.u32 63, %v42_v54 }
  0xd6   :  { %v106_v0 = vmul.f32 %v703_v29, %v100_v61 }
  0xd7   :  { %vm350_vm0 = vcmp.ge.s32.totalorder %v47_v57, 1  ;;  %vm359_vm3 = vcmp.ge.s32.totalorder %v47_v57, 8  ;;  %vm366_vm4 = vcmp.ge.s32.totalorder %v47_v57, 9 }
  0xd8   :  { %v107_v3 = vadd.f32 %v106_v0, %v97_v62 }
  0xda   :  { %364 = vrot.lane.b32.xlu1 %v107_v3, %s583_s1  ;;  %v224_v7 = vpop.permute.xlu1 %223 }
  0xdb   :  { %v230_v11 = vmul.f32 %v229_v46, %v224_v7 }
  0xdd   :  { %v231_v16 = vadd.f32 %v230_v11, %v220_v10 }
  0xdf   :  { %v234_v58 = vpop.permute.xlu1 %233 }
  0xe0   :  { %v240_v18 = vmul.f32 %v239_v12, %v234_v58 }
  0xe2   :  { %v241_v20 = vadd.f32 %v240_v18, %v231_v16 }
  0xe4   :  { %v254_v59 = vpop.permute.xlu1 %253  ;;  %v251_v21 = vadd.f32 %v250_v19, %v241_v20 }
  0xe5   :  { %v256_v22 = vmul.f32 %v254_v59, %v660_v55 }
  0xe7   :  { %v257_v25 = vadd.f32 %v256_v22, %v251_v21 }
  0xe9   :  { %v260_v26 = vpop.permute.xlu1 %259 }
  0xea   :  { %v262_v27 = vmul.f32 %v260_v26, %v657_v52  ;;  %v326_v52 = vpop.permute.xlu0 %325 }
  0xeb   :  { %v328_v40 = vmul.f32 %v326_v52, %v688_v9 }
  0xec   :  { %v263_v63 = vadd.f32 %v262_v27, %v257_v25 }
  0xee   :  { %v272_v28 = vpop.permute.xlu1 %271  ;;  %v269_v51 = vadd.f32 %v268_v45, %v263_v63 }
  0xef   :  { %v274_v6 = vmul.f32 %v272_v28, %v673_v2 }
  0xf1   :  { %v275_v31 = vadd.f32 %v274_v6, %v269_v51 }
  0xf3   :  { %v302_v32 = vpop.permute.xlu1 %301 }
  0xf4   :  { %v304_v33 = vmul.f32 %v302_v32, %v677_v4  ;;  %v344_v4 = vpop.permute.xlu0 %343 }
  0xf5   :  { %v346_v50 = vmul.f32 %v344_v4, %v703_v29 }
  0xf6   :  { %v305_v55 = vadd.f32 %v304_v33, %v275_v31 }
  0xf8   :  { %v314_v35 = vpop.permute.xlu1 %313  ;;  %v311_v36 = vadd.f32 %v310_v34, %v305_v55  ;;  %v374_v42 = vpop.permute.xlu0 %373 }
  0xf9   :  { %v316_v37 = vmul.f32 %v314_v35, %v686_v8 }
  0xfb   :  { %v317_v38 = vadd.f32 %v316_v37, %v311_v36 }
  0xfd   :  { %v320_v56 = vpop.permute.xlu1 %319 }
  0xfe   :  { %v322_v39 = vmul.f32 %v320_v56, %v693_v15  ;;  %v59_v15 = vand.u32 7, %v42_v54 }
 0x100   :  { %v323_v2 = vadd.f32 %v322_v39, %v317_v38  ;;  %vm351_vm1 = vcmp.ne.s32.totalorder %v59_v15, 0 }
 0x101   :  { %vm352_vm2 = vmand %vm350_vm0, %vm351_vm1 }
 0x102   :  { %v332_v41 = vpop.permute.xlu1 %331  ;;  %v329_v44 = vadd.f32 %v328_v40, %v323_v2  ;;  %vm367_vm5 = vmand %vm366_vm4, %vm351_vm1 }
 0x103   :  { %v334_v47 = vmul.f32 %v332_v41, %v695_v17 }
 0x105   :  { %v335_v48 = vadd.f32 %v334_v47, %v329_v44 }
 0x107   :  { %v338_v5 = vpop.permute.xlu1 %337 }
 0x108   :  { %v340_v49 = vmul.f32 %v338_v5, %v701_v24 }
 0x10a   :  { %v341_v8 = vadd.f32 %v340_v49, %v335_v48 }
 0x10c   :  { %v347_v53 = vadd.f32 %v346_v50, %v341_v8 }
 0x142   :  { %v349_v9 = vpop.permute.xlu1 %348 }
 0x143   :  { %v355_v60 = vsel %vm352_vm2, %v349_v9, 0.0 }
 0x144   :  { %v356_v62 = vadd.f32 %v355_v60, %v347_v53 }
 0x147   :  { %v358_v17 = vpop.permute.xlu1 %357 }
 0x148   :  { %v362_v61 = vsel %vm359_vm3, %v358_v17, 0.0 }
 0x149   :  { %v363_v24 = vadd.f32 %v362_v61, %v356_v62 }
 0x14c   :  { %v365_v0 = vpop.permute.xlu1 %364 }
 0x14d   :  { %v370_v29 = vsel %vm367_vm5, %v365_v0, 0.0 }
 0x14e   :  { %v371_v43 = vadd.f32 %v370_v29, %v363_v24 }
 0x150   :  { %v376_v46 = vadd.f32 %v374_v42, %v371_v43 }
 0x152   :  { %377 = vst [vmem:[#allocation7] sm:$0xff] %v376_v46 }
 0x153   :  { %526 = shalt.err (!%p523_p0)
}
 0x154   :  { %387 = dma.vmem_to_hbm [thread:$0]  %s385_s22, 128, %s745_s2, [#allocation4]  }
 0x155   :  { %539 = dma.done.wait [#allocation4], 128  }
 0x156   :  { %540 = vsyncadd [#allocation4], 4294967168 }
 0x157   :  { %391 = vsyncpa [#allocation3], 1 }
 0x158   :  { %392 = vsyncpa [#allocation6], 1 }
 0x159   :  { %393 = vsyncpa [#allocation4], 1 }

</bundles_post_ra>
